<compile_context>
chip_gen: v7x
topology: tpu7x:2x2x1
jax: 0.10.0
libtpu: 0.0.40
codegen_flags: <defaults>
</compile_context>

<pallas_src>
import jax
import jax.numpy as jnp
from jax.experimental import pallas as pl
from jax.experimental.pallas import tpu as pltpu

INF = 2    # input features
HID = 16   # hidden units
OUTF = 1   # output features

DEFAULT_TILE = 8192  # batch columns per grid step (lane-dense multiple of 128)


def _round_up(x, m):
    return ((x + m - 1) // m) * m


def _mlp_kernel(x_ref, w1_ref, b1_ref, w2_ref, b2_ref, w3_ref, b3_ref, o_ref):
    # Everything in this kernel is (features, TILE): lane dim is the batch.
    x = x_ref[...]                                   # (INF, TILE)
    w1 = w1_ref[...]                                 # (HID, INF)  == (out, in)

    # Layer 1 (2 -> 16): a K=2 matmul is pure MXU fill/drain latency, so do it
    # as two broadcast FMAs on the VPU instead.
    h1 = w1[:, 0:1] * x[0:1, :] + w1[:, 1:2] * x[1:2, :] + b1_ref[...]
    h1 = jnp.maximum(h1, 0.0)                        # ReLU, (HID, TILE)

    # Layer 2 (16 -> 16): MXU matmul with f32 accumulation.
    h2 = jnp.dot(w2_ref[...], h1, preferred_element_type=jnp.float32) + b2_ref[...]
    h2 = jnp.maximum(h2, 0.0)                        # ReLU, (HID, TILE)

    # Layer 3 (16 -> 1): multiply + 16-term sublane reduce; keeps the MXU out
    # of an N_out=1 drain and the output lane-dense.
    y = jnp.sum(w3_ref[...] * h2, axis=0, keepdims=True) + b3_ref[...]  # (OUTF, TILE)

    o_ref[...] = y.astype(o_ref.dtype)


def moon_model_forward(x, params, tile=DEFAULT_TILE):
    """x: (N, INF) float32, params from init_params. Returns (N, OUTF) float32."""
    n = x.shape[0]

    # Lane-dense batch tile (multiple of 128), clamped for tiny inputs.
    tile = max(128, min(tile, _round_up(n, 128)))
    tile = _round_up(tile, 128)
    n_pad = _round_up(n, tile)
    grid = (n_pad // tile,)

    # Batch-on-lanes input; zero-padding is harmless (compute is per-column).
    xt = jnp.pad(x.T, ((0, 0), (0, n_pad - n)))      # (INF, n_pad)

    # One-time tiny reshapes/transposes to (out, in) / (features, 1) layouts.
    w1 = params["w1"].T                              # (HID, INF)
    b1 = params["b1"].reshape(HID, 1)
    w2 = params["w2"].T                              # (HID, HID)
    b2 = params["b2"].reshape(HID, 1)
    w3 = params["w3"]                                # (HID, OUTF) — used as (16,1) column
    b3 = params["b3"].reshape(OUTF, 1)

    const = lambda i: (0, 0)                         # weights resident across the grid

    out_t = pl.pallas_call(
        _mlp_kernel,
        out_shape=jax.ShapeDtypeStruct((OUTF, n_pad), jnp.float32),
        grid=grid,
        in_specs=[
            pl.BlockSpec((INF, tile), lambda i: (0, i)),   # x: row-tiled, pipelined
            pl.BlockSpec((HID, INF), const),
            pl.BlockSpec((HID, 1), const),
            pl.BlockSpec((HID, HID), const),
            pl.BlockSpec((HID, 1), const),
            pl.BlockSpec((HID, OUTF), const),
            pl.BlockSpec((OUTF, 1), const),
        ],
        out_specs=pl.BlockSpec((OUTF, tile), lambda i: (0, i)),
        compiler_params=pltpu.CompilerParams(
            dimension_semantics=("parallel",)),
    )(xt, w1, b1, w2, b2, w3, b3)

    return out_t[:, :n].T                            # back to (N, OUTF)


def init_params(key):
    """Deterministic init mimicking nn.Linear's U(-1/sqrt(fan_in), 1/sqrt(fan_in))."""
    ks = jax.random.split(key, 6)

    def linear(kw, kb, fan_in, fan_out):
        bound = 1.0 / jnp.sqrt(float(fan_in))
        # stored as (in, out) so math is x @ W
        w = jax.random.uniform(kw, (fan_in, fan_out), jnp.float32, -bound, bound)
        b = jax.random.uniform(kb, (1, fan_out), jnp.float32, -bound, bound)
        return w, b

    w1, b1 = linear(ks[0], ks[1], INF, HID)
    w2, b2 = linear(ks[2], ks[3], HID, HID)
    w3, b3 = linear(ks[4], ks[5], HID, OUTF)
    return dict(w1=w1, b1=b1, w2=w2, b2=b2, w3=w3, b3=b3)


def reference_forward(x, p):
    h1 = jnp.maximum(x @ p["w1"] + p["b1"], 0.0)
    h2 = jnp.maximum(h1 @ p["w2"] + p["b2"], 0.0)
    return h2 @ p["w3"] + p["b3"]


if __name__ == "__main__":
    key = jax.random.PRNGKey(0)
    pkey, xkey = jax.random.split(key)
    params = init_params(pkey)

    # Small batch of 2-D "moons" points.
    x = jax.random.normal(xkey, (8, INF), jnp.float32)
    out = jax.block_until_ready(moon_model_forward(x, params))
    ref = reference_forward(x, params)
    assert out.shape == (8, OUTF)
    assert jnp.allclose(out, ref, atol=1e-5, rtol=1e-5), "mismatch vs reference (small)"

    # Non-tile-aligned larger batch to exercise padding + a multi-step grid.
    x2 = jax.random.normal(jax.random.PRNGKey(1), (2000, INF), jnp.float32)
    out2 = jax.block_until_ready(moon_model_forward(x2, params, tile=512))
    ref2 = reference_forward(x2, params)
    assert out2.shape == (2000, OUTF)
    assert jnp.allclose(out2, ref2, atol=1e-5, rtol=1e-5), "mismatch vs reference (tiled)"

    print("KERNEL_OK")
</pallas_src>

<mosaic_0001>
module attributes {stable_mosaic.version = 11 : i64} {
  func.func @_mlp_kernel(%arg0: i32, %arg1: memref<2x128xf32, #tpu.memory_space<vmem>>, %arg2: memref<16x2xf32, #tpu.memory_space<vmem>>, %arg3: memref<16x1xf32, #tpu.memory_space<vmem>>, %arg4: memref<16x16xf32, #tpu.memory_space<vmem>>, %arg5: memref<16x1xf32, #tpu.memory_space<vmem>>, %arg6: memref<16x1xf32, #tpu.memory_space<vmem>>, %arg7: memref<1x1xf32, #tpu.memory_space<vmem>>, %arg8: memref<1x128xf32, #tpu.memory_space<vmem>>) attributes {dimension_semantics = [#tpu.dimension_semantics<parallel>], iteration_bounds = array<i64: 1>, scalar_prefetch = 0 : i64, scratch_operands = 0 : i64, tpu.core_type = #tpu.core_type<tc>, window_params = [{transform_indices = @transform_0, window_bounds = array<i64: 2, 128>}, {pipeline_mode = #tpu.pipeline_mode<synchronous>, transform_indices = @transform_1, window_bounds = array<i64: 16, 2>}, {pipeline_mode = #tpu.pipeline_mode<synchronous>, transform_indices = @transform_2, window_bounds = array<i64: 16, 1>}, {pipeline_mode = #tpu.pipeline_mode<synchronous>, transform_indices = @transform_3, window_bounds = array<i64: 16, 16>}, {pipeline_mode = #tpu.pipeline_mode<synchronous>, transform_indices = @transform_4, window_bounds = array<i64: 16, 1>}, {pipeline_mode = #tpu.pipeline_mode<synchronous>, transform_indices = @transform_5, window_bounds = array<i64: 16, 1>}, {pipeline_mode = #tpu.pipeline_mode<synchronous>, transform_indices = @transform_6, window_bounds = array<i64: 1, 1>}, {transform_indices = @transform_7, window_bounds = array<i64: 1, 128>}]} {
    %c0 = arith.constant 0 : index
    %c0_0 = arith.constant 0 : index
    %0 = vector.load %arg1[%c0, %c0_0] : memref<2x128xf32, #tpu.memory_space<vmem>>, vector<2x128xf32>
    %c0_1 = arith.constant 0 : index
    %c0_2 = arith.constant 0 : index
    %1 = vector.load %arg2[%c0_1, %c0_2] : memref<16x2xf32, #tpu.memory_space<vmem>>, vector<16x2xf32>
    %2 = vector.extract_strided_slice %1 {offsets = [0, 0], sizes = [16, 1], strides = [1, 1]} : vector<16x2xf32> to vector<16x1xf32>
    %3 = vector.extract_strided_slice %0 {offsets = [0, 0], sizes = [1, 128], strides = [1, 1]} : vector<2x128xf32> to vector<1x128xf32>
    %4 = vector.broadcast %2 : vector<16x1xf32> to vector<16x128xf32>
    %5 = vector.broadcast %3 : vector<1x128xf32> to vector<16x128xf32>
    %6 = arith.mulf %4, %5 : vector<16x128xf32>
    %7 = vector.extract_strided_slice %1 {offsets = [0, 1], sizes = [16, 1], strides = [1, 1]} : vector<16x2xf32> to vector<16x1xf32>
    %8 = vector.extract_strided_slice %0 {offsets = [1, 0], sizes = [1, 128], strides = [1, 1]} : vector<2x128xf32> to vector<1x128xf32>
    %9 = vector.broadcast %7 : vector<16x1xf32> to vector<16x128xf32>
    %10 = vector.broadcast %8 : vector<1x128xf32> to vector<16x128xf32>
    %11 = arith.mulf %9, %10 : vector<16x128xf32>
    %12 = arith.addf %6, %11 : vector<16x128xf32>
    %c0_3 = arith.constant 0 : index
    %c0_4 = arith.constant 0 : index
    %13 = vector.load %arg3[%c0_3, %c0_4] : memref<16x1xf32, #tpu.memory_space<vmem>>, vector<16x1xf32>
    %14 = vector.broadcast %13 : vector<16x1xf32> to vector<16x128xf32>
    %15 = arith.addf %12, %14 : vector<16x128xf32>
    %cst = arith.constant 0.000000e+00 : f32
    %16 = vector.broadcast %cst : f32 to vector<16x128xf32>
    %17 = arith.maximumf %15, %16 : vector<16x128xf32>
    %c0_5 = arith.constant 0 : index
    %c0_6 = arith.constant 0 : index
    %18 = vector.load %arg4[%c0_5, %c0_6] : memref<16x16xf32, #tpu.memory_space<vmem>>, vector<16x16xf32>
    %cst_7 = arith.constant dense<0.000000e+00> : vector<16x128xf32>
    %19 = tpu.matmul %18, %17, %cst_7 {dimension_numbers = #tpu.dot_dimension_numbers<[1], [0], [0], [1], [0, 0, 1, 1], [], []>} : vector<16x16xf32>, vector<16x128xf32>, vector<16x128xf32> -> vector<16x128xf32>
    %c0_8 = arith.constant 0 : index
    %c0_9 = arith.constant 0 : index
    %20 = vector.load %arg5[%c0_8, %c0_9] : memref<16x1xf32, #tpu.memory_space<vmem>>, vector<16x1xf32>
    %21 = vector.broadcast %20 : vector<16x1xf32> to vector<16x128xf32>
    %22 = arith.addf %19, %21 : vector<16x128xf32>
    %cst_10 = arith.constant 0.000000e+00 : f32
    %23 = vector.broadcast %cst_10 : f32 to vector<16x128xf32>
    %24 = arith.maximumf %22, %23 : vector<16x128xf32>
    %c0_11 = arith.constant 0 : index
    %c0_12 = arith.constant 0 : index
    %25 = vector.load %arg6[%c0_11, %c0_12] : memref<16x1xf32, #tpu.memory_space<vmem>>, vector<16x1xf32>
    %26 = vector.broadcast %25 : vector<16x1xf32> to vector<16x128xf32>
    %27 = arith.mulf %26, %24 : vector<16x128xf32>
    %cst_13 = arith.constant dense<0.000000e+00> : vector<128xf32>
    %28 = vector.multi_reduction <add>, %27, %cst_13 [0] : vector<16x128xf32> to vector<128xf32>
    %29 = vector.shape_cast %28 : vector<128xf32> to vector<1x128xf32>
    %c0_14 = arith.constant 0 : index
    %c0_15 = arith.constant 0 : index
    %30 = vector.load %arg7[%c0_14, %c0_15] : memref<1x1xf32, #tpu.memory_space<vmem>>, vector<1x1xf32>
    %31 = vector.broadcast %30 : vector<1x1xf32> to vector<1x128xf32>
    %32 = arith.addf %29, %31 : vector<1x128xf32>
    %c0_16 = arith.constant 0 : index
    %c0_17 = arith.constant 0 : index
    %33 = vector.load %arg8[%c0_16, %c0_17] : memref<1x128xf32, #tpu.memory_space<vmem>>, vector<1x128xf32>
    tpu.vector_store %arg8[%c0_16, %c0_17], %32 {strides = array<i32>} : memref<1x128xf32, #tpu.memory_space<vmem>>, vector<1x128xf32>,
    return
  }
  func.func @transform_0(%arg0: i32) -> (i32, i32) {
    %c0_i32 = arith.constant 0 : i32
    %c0_i32_0 = arith.constant 0 : i32
    return %c0_i32, %arg0 : i32, i32
  }
  func.func @transform_1(%arg0: i32) -> (i32, i32) {
    %c0_i32 = arith.constant 0 : i32
    %c0_i32_0 = arith.constant 0 : i32
    %c0_i32_1 = arith.constant 0 : i32
    return %c0_i32, %c0_i32_0 : i32, i32
  }
  func.func @transform_2(%arg0: i32) -> (i32, i32) {
    %c0_i32 = arith.constant 0 : i32
    %c0_i32_0 = arith.constant 0 : i32
    %c0_i32_1 = arith.constant 0 : i32
    return %c0_i32, %c0_i32_0 : i32, i32
  }
  func.func @transform_3(%arg0: i32) -> (i32, i32) {
    %c0_i32 = arith.constant 0 : i32
    %c0_i32_0 = arith.constant 0 : i32
    %c0_i32_1 = arith.constant 0 : i32
    return %c0_i32, %c0_i32_0 : i32, i32
  }
  func.func @transform_4(%arg0: i32) -> (i32, i32) {
    %c0_i32 = arith.constant 0 : i32
    %c0_i32_0 = arith.constant 0 : i32
    %c0_i32_1 = arith.constant 0 : i32
    return %c0_i32, %c0_i32_0 : i32, i32
  }
  func.func @transform_5(%arg0: i32) -> (i32, i32) {
    %c0_i32 = arith.constant 0 : i32
    %c0_i32_0 = arith.constant 0 : i32
    %c0_i32_1 = arith.constant 0 : i32
    return %c0_i32, %c0_i32_0 : i32, i32
  }
  func.func @transform_6(%arg0: i32) -> (i32, i32) {
    %c0_i32 = arith.constant 0 : i32
    %c0_i32_0 = arith.constant 0 : i32
    %c0_i32_1 = arith.constant 0 : i32
    return %c0_i32, %c0_i32_0 : i32, i32
  }
  func.func @transform_7(%arg0: i32) -> (i32, i32) {
    %c0_i32 = arith.constant 0 : i32
    %c0_i32_0 = arith.constant 0 : i32
    return %c0_i32, %arg0 : i32, i32
  }
}

</mosaic_0001>

<bundles_post_ra>
// kernel: tpu_custom_call.1
= control target key start
LH: loop header
LB: loop body
LE: loop exit
PB: predicated region body
PF: predicated region fallthrough
CT: control target
= control target key end

     0   :  { %s365_s0 = inlined_call_operand.vmem [shape: f32[2,128], index: 0, kind: input, shape index: {}]   ;;  %s366_s1 = inlined_call_operand.vmem [shape: f32[16,2], index: 1, kind: input, shape index: {}]   ;;  %s367_s2 = inlined_call_operand.vmem [shape: f32[16,1], index: 2, kind: input, shape index: {}]   ;;  %s368_s3 = inlined_call_operand.vmem [shape: f32[16,16], index: 3, kind: input, shape index: {}]   ;;  %s369_s4 = inlined_call_operand.vmem [shape: f32[16,1], index: 4, kind: input, shape index: {}]   ;;  %s370_s5 = inlined_call_operand.vmem [shape: f32[16,1], index: 5, kind: input, shape index: {}]   ;;  %s371_s6 = inlined_call_operand.<no memory space> [shape: f32[1,1], index: 6, kind: input, shape index: {}]   ;;  %s372_s7 = inlined_call_operand.hbm [shape: f32[1,128], index: 7, kind: output, shape index: {}]  }
   0x1   :  { %v12_v0 = vstv %s371_s6 }
   0x2   :  { %13 = vst [vmem:[#allocation2] sm:$0x1] %v12_v0 }
   0x3   :  { %v30_v1 = vld [vmem:[%s366_s1] sm:$0xff]  ;;  %v272_v2 = vmov 1   ;;  %v273_v3 = vmov 0   ;;  %v31_v4 = vld [vmem:[%s366_s1 + $0x8] sm:$0xff] }
   0x4   :  { %246 = vset.pattern.permute.xlu1 %v272_v2  ;;  %245 = vset.pattern.permute.xlu0 %v273_v3 }
   0x5   :  { %49 = vperm.xlu1 %246, %v30_v1   ;;  %34 = vperm.xlu0 %245, %v30_v1  }
   0x6   :  { %14 = vsyncpa [#allocation4], 0  ;;  %v64_v5 = vld [vmem:[%s367_s2] sm:$0xff]  ;;  %v65_v6 = vld [vmem:[%s367_s2 + $0x8] sm:$0xff]  ;;  %vm94_vm0 = vcmask 130048   ;;  %v42_v13 = vlaneseq }
   0x7   :  { %v82_v7 = vld [vmem:[%s369_s4] sm:$0xff]  ;;  %v83_v8 = vld [vmem:[%s369_s4 + $0x8] sm:$0xff] }
   0x8   :  { %v178_v9 = vld [vmem:[%s370_s5] sm:$0xff]  ;;  %v179_v10 = vld [vmem:[%s370_s5 + $0x8] sm:$0xff]  ;;  %v43_v14 = vshrl.u32 %v42_v13, 7 }
   0x9   :  { %53 = vperm.xlu1 %246, %v31_v4   ;;  %39 = vperm.xlu0 %245, %v31_v4   ;;  %v80_v11 = vld [vmem:[%s368_s3] sm:$0xff]  ;;  %v81_v37 = vld [vmem:[%s368_s3 + $0x8] sm:$0xff]  ;;  %s274_s3 = smov [#allocation3]  }
   0xa   :  { %v199_v12 = vld [vmem:[#allocation2] sm:$0x1]  ;;  %235 = vmatprep.mubr.msk.f32.mxu0 %vm94_vm0, %v80_v11  ;;  %v58_v15 = vsub.s32 1, %v43_v14  ;;  %v44_v16 = vsub.s32 0, %v43_v14  ;;  %s217_s19 = sshll.u32 %s274_s3, 4  ;;  %s218_s19 = int_to_ptr.vmem [resolvable:$true] %s217_s19 }
   0xb   :  { %v29_v17 = vld [vmem:[%s365_s0] sm:$0x3]  ;;  %s248_s20 = scalar_lea.vmem %s218_s19, 16  ;;  %s252_s21 = scalar_lea.vmem %s218_s19, 32 }
   0xc   :  { %v59_v18 = vrot.slane %v29_v17, %v58_v15  ;;  %v45_v19 = vrot.slane %v29_v17, %v44_v16  ;;  %p249_p0 = scmp.ne.s32.totalorder %s218_s19, %s248_s20  ;;  %p253_p1 = scmp.lt.s32.totalorder %s218_s19, %s218_s19 }
   0xd   :  { %247 = vset.pattern.permute.xlu1 %v273_v3  ;;  %68 = vperm.xlu0 %245, %v64_v5   ;;  %p254_p2 = scmp.lt.s32.totalorder %s252_s21, %s248_s20 }
   0xe   :  { %73 = vperm.xlu1 %247, %v65_v6  }
   0xf   :  { %p255_p3 = por %p254_p2, %p253_p1 }
  0x11   :  { %86 = vperm.xlu0 %245, %v82_v7   ;;  %p256_p4 = pnand %p255_p3, %p249_p0 }
  0x12   :  { %91 = vperm.xlu1 %247, %v83_v8  }
  0x15   :  { %182 = vperm.xlu0 %245, %v178_v9  }
  0x16   :  { %187 = vperm.xlu1 %247, %v179_v10  }
  0x19   :  { %202 = vperm.xlu0 %245, %v199_v12  }
  0x84   :  { %v50_v20 = vpop.permute.xlu1 %49  ;;  %v35_v21 = vpop.permute.xlu0 %34 }
  0x85   :  { %v60_v22 = vmul.f32 %v59_v18, %v50_v20  ;;  %v46_v23 = vmul.f32 %v45_v19, %v35_v21 }
  0x87   :  { %v62_v28 = vadd.f32 %v60_v22, %v46_v23 }
  0x88   :  { %v54_v24 = vpop.permute.xlu1 %53  ;;  %v40_v25 = vpop.permute.xlu0 %39 }
  0x89   :  { %v61_v26 = vmul.f32 %v59_v18, %v54_v24  ;;  %v47_v27 = vmul.f32 %v45_v19, %v40_v25 }
  0x8b   :  { %v63_v29 = vadd.f32 %v61_v26, %v47_v27 }
  0x8c   :  { %v69_v30 = vpop.permute.xlu0 %68 }
  0x8d   :  { %v76_v31 = vadd.f32 %v69_v30, %v62_v28  ;;  %v74_v32 = vpop.permute.xlu1 %73 }
  0x8e   :  { %v77_v33 = vadd.f32 %v74_v32, %v63_v29 }
  0x8f   :  { %v78_v34 = vmax.f32 %v76_v31, 0.0 }
  0x90   :  { %v79_v35 = vmax.f32 %v77_v33, 0.0  ;;  %v87_v39 = vpop.permute.xlu0 %86 }
  0x91   :  { %v92_v38 = vpop.permute.xlu1 %91 }
  0x92   :  { %v238_v36 = vpack.c.bf16 %v79_v35, %v78_v34 }
  0x94   :  { %239 = vmatprep.subr.bf16.mxu0 %v238_v36  ;;  %v183_v47 = vpop.permute.xlu0 %182 }
  0x95   :  { %241 = vmatpush3.bf16.msra.mxu0 %v238_v36  ;;  %v188_v45 = vpop.permute.xlu1 %187 }
  0x98   :  { %236 = vmatmul.mubr.msk.f32.vlgmr.msra.gmra.mrb[0].mxu0 %vm94_vm0, %v81_v37  ;;  %v203_v55 = vpop.permute.xlu0 %202 }
  0x99   :  { %v208_v57 = vrot.slane %v203_v55, %v44_v16 }
 0x16b   :  { %v237_v40 = vpop.f32.mrb[0].mxu0 }
 0x16c   :  { %v173_v41 = vadd.f32 %v237_v40, %v92_v38  ;;  %v167_v42 = vpop.f32.mrb[1].mxu0 }
 0x16d   :  { %v168_v43 = vadd.f32 %v167_v42, %v87_v39 }
 0x16e   :  { %v177_v44 = vmax.f32 %v173_v41, 0.0 }
 0x16f   :  { %v176_v46 = vmax.f32 %v168_v43, 0.0 }
 0x170   :  { %v191_v48 = vmul.f32 %v188_v45, %v177_v44 }
 0x171   :  { %v190_v49 = vmul.f32 %v183_v47, %v176_v46 }
 0x173   :  { %v192_v50 = vadd.f32 %v191_v48, %v190_v49 }
 0x175   :  { %v193_v51 = vrot.slane %v192_v50, 4 }
 0x177   :  { %v194_v52 = vadd.f32 %v193_v51, %v192_v50 }
 0x179   :  { %v195_v53 = vrot.slane %v194_v52, 2 }
 0x17b   :  { %v196_v54 = vadd.f32 %v195_v53, %v194_v52 }
 0x17d   :  { %v197_v56 = vrot.slane %v196_v54, 1 }
 0x17f   :  { %v198_v58 = vadd.f32 %v197_v56, %v196_v54 }
 0x181   :  { %v209_v59 = vadd.f32 %v208_v57, %v198_v58 }
 0x183   :  { %210 = vst [vmem:[#allocation3] sm:$0x1] %v209_v59 }
 0x184   :  { %259 = shalt.err (!%p256_p4)
}
 0x185   :  { %s260_s24 = scalar_lea.hbm %s372_s7, 16 }
 0x186   :  { %p261_p5 = scmp.ne.s32.totalorder %s372_s7, %s260_s24  ;;  %p264_p6 = scmp.lt.u32.totalorder %s260_s24, %s372_s7 }
 0x188   :  { %p266_p7 = pnand %p264_p6, %p261_p5 }
 0x18a   :  { %269 = shalt.err (!%p266_p7)
}
 0x18b   :  { %220 = dma.vmem_to_hbm [thread:$0]  %s218_s19, 16, %s372_s7, [#allocation4]  }
 0x18c   :  { %270 = dma.done.wait [#allocation4], 16  }
 0x18d   :  { %271 = vsyncadd [#allocation4], 4294967280 }
 0x18e   :  { %224 = vsyncpa [#allocation4], 1 }

</bundles_post_ra>
